<compile_context>
chip_gen: v6e
topology: v6e:2x2x1
jax: 0.10.0
libtpu: 0.0.40
codegen_flags: <defaults>
</compile_context>

<pallas_src>
import functools

import jax
import jax.numpy as jnp
from jax.experimental import pallas as pl
from jax.experimental.pallas import tpu as pltpu

_MB = 1024 * 1024


def _mlp_pair_kernel(a_ref, c_ref, w2_ref, b2_ref, w3_ref, b3_ref, o_ref, *,
                     h1_in_f32):
    # Blocks: a (1, TI, hidden) bf16, c (1, TJ, hidden) bf16; weights resident.
    a = a_ref[0]                                                 # (TI, hidden)
    c = c_ref[0]                                                 # (TJ, hidden)
    tile_i, hidden = a.shape
    tile_j = c.shape[0]
    num_labels = w3_ref.shape[1]

    if h1_in_f32:                                                # v5e: no bf16 VALU
        a = a.astype(jnp.float32)
        c = c.astype(jnp.float32)

    # Layer-1 epilogue over the pair tile: broadcast add + ReLU.
    # (b1 is already folded into `a` by the wrapper; dropout = identity in eval.)
    h1 = jnp.maximum(a[:, None, :] + c[None, :, :], 0)           # (TI, TJ, hidden)
    h1 = h1.reshape(tile_i * tile_j, hidden).astype(jnp.bfloat16)

    # Layer 2 (dominant GEMM): M = TI*TJ, K = N = hidden; bf16 in, f32 acc.
    h2 = jnp.dot(h1, w2_ref[...], preferred_element_type=jnp.float32) + b2_ref[...]
    h2 = jnp.maximum(h2, 0.0).astype(jnp.bfloat16)               # dropout: identity

    # Output layer (num_labels tiny; FLOPs negligible vs layer 2).
    out = jnp.dot(h2, w3_ref[...], preferred_element_type=jnp.float32) + b3_ref[...]
    out = out.reshape(tile_i, tile_j, num_labels)                # out[i, j, c]
    # permute(0,1,3,2): per-tile transpose -> j lands in lanes (lane-dense store).
    o_ref[0] = jnp.transpose(out, (0, 2, 1))                     # (TI, C, TJ)


def _round_up(x, m):
    return ((x + m - 1) // m) * m


def _vmem_capacity_bytes():
    """Per-core VMEM capacity; conservative (v7x = 64 MiB/TC) fallback."""
    try:
        return int(pltpu.get_tpu_info().vmem_capacity_bytes)
    except Exception:
        return 64 * _MB


def _pick_tiles(L, vmem_capacity):
    """TJ lane-dense (multiple of 128) when L allows, TI a multiple of 8."""
    if L >= 128:
        # 128 MiB parts (v5e/v6e) can keep the bigger j tile resident.
        tile_j = 256 if (vmem_capacity >= 100 * _MB and L >= 256) else 128
    else:
        tile_j = _round_up(L, 8)          # single full-extent (padded) j block
    tile_i = 16 if L >= 16 else _round_up(L, 8)
    return tile_i, tile_j


def mlp_layer_forward(x, params, *, tile_i=None, tile_j=None,
                      vmem_limit_bytes=None, h1_in_f32=False):
    """x: (B, L, H) float32. Returns (B, L, num_labels, L) float32.

    tile_i / tile_j set the pair-space tile (auto-picked per TPU generation:
    TJ=128 on v7x's 64 MiB/TC VMEM, TJ=256 on v5e/v6e's 128 MiB; TI=16).
    TI*TJ is the M dim of the dominant layer-2 GEMM, so M ~ 2k-4k saturates the
    MXU while keeping h1/h2 intermediates well inside the VMEM limit.
    h1_in_f32=True keeps the broadcast-add/ReLU in f32 (useful on v5e, which
    has no bf16 VALU); bf16 weights/activations with f32 accumulation are an
    intentional inference-precision choice (see tolerance in __main__).
    """
    B, L, H = x.shape
    w1, b1, w2, b2, w3, b3 = params
    two_h, hidden = w1.shape
    assert two_h == 2 * H
    num_labels = w3.shape[1]

    cap = _vmem_capacity_bytes()
    if vmem_limit_bytes is None:
        vmem_limit_bytes = min(96 * _MB, cap) if cap >= 100 * _MB else min(48 * _MB, cap)

    auto_i, auto_j = _pick_tiles(L, cap)
    user_i = tile_i is not None
    tile_i = tile_i if user_i else auto_i
    tile_j = tile_j if tile_j is not None else auto_j
    if not user_i:
        # Keep the dominant live intermediates (h1 bf16 + h2 f32 + h2 bf16 ~ 8 B/elem)
        # within ~1/3 of the VMEM budget; weights + pipeline buffers use the rest.
        while tile_i > 8 and tile_i * tile_j * hidden * 8 > vmem_limit_bytes // 3:
            tile_i //= 2
    assert tile_i % 8 == 0 and tile_j % 8 == 0, (tile_i, tile_j)
    # Lane-dense output stores: TJ multiple of 128, or a single full-extent block.
    assert tile_j % 128 == 0 or tile_j >= L, (tile_j, L)

    Lp_i = _round_up(L, tile_i)
    Lp_j = _round_up(L, tile_j)

    # ---- Layer 1 hoisted out of the pair grid (one plain XLA GEMM over (B,L)) ----
    a_side = (jnp.dot(x, w1[:H, :]) + b1).astype(jnp.bfloat16)   # (B, L, hidden)
    c_side = jnp.dot(x, w1[H:, :]).astype(jnp.bfloat16)          # (B, L, hidden)
    if Lp_i != L:
        a_side = jnp.pad(a_side, ((0, 0), (0, Lp_i - L), (0, 0)))
    if Lp_j != L:
        c_side = jnp.pad(c_side, ((0, 0), (0, Lp_j - L), (0, 0)))

    # Resident kernel weights in bf16 (native MXU input, half the DMA / VMEM);
    # biases stay f32 (added to the f32 accumulators).
    w2_bf = w2.astype(jnp.bfloat16)
    w3_bf = w3.astype(jnp.bfloat16)
    b2_2d = b2.reshape(1, hidden).astype(jnp.float32)
    b3_2d = b3.reshape(1, num_labels).astype(jnp.float32)

    kernel = functools.partial(_mlp_pair_kernel, h1_in_f32=h1_in_f32)

    grid = (B, Lp_i // tile_i, Lp_j // tile_j)
    # Constant index_maps -> these blocks are DMA'd only once per core.
    # TODO(synk): single-buffer them (pipeline_mode=pl.Buffered(1)) to reclaim the
    # second VMEM copy (~2*hidden^2*2 bytes at large hidden) once verified to lower.
    const = lambda b, i, j: (0, 0)

    gi, gj = grid[1], grid[2]
    pair = B * Lp_i * Lp_j
    flops = 2 * pair * hidden * (hidden + num_labels) + 2 * pair * hidden
    bytes_accessed = (B * gj * Lp_i * hidden * 2        # A re-read once per j block
                      + B * gi * Lp_j * hidden * 2      # C re-read once per i block
                      + (w2_bf.size + w3_bf.size) * 2
                      + (b2.size + b3.size) * 4
                      + pair * num_labels * 4)          # output store

    out = pl.pallas_call(
        kernel,
        out_shape=jax.ShapeDtypeStruct((B, Lp_i, num_labels, Lp_j), jnp.float32),
        grid_spec=pltpu.PrefetchScalarGridSpec(
            num_scalar_prefetch=0,
            grid=grid,
            in_specs=[
                pl.BlockSpec((1, tile_i, hidden), lambda b, i, j: (b, i, 0)),  # A (i side)
                pl.BlockSpec((1, tile_j, hidden), lambda b, i, j: (b, j, 0)),  # C (j side)
                pl.BlockSpec((hidden, hidden), const),                         # W2
                pl.BlockSpec((1, hidden), const),                              # b2
                pl.BlockSpec((hidden, num_labels), const),                     # W3
                pl.BlockSpec((1, num_labels), const),                          # b3
            ],
            out_specs=pl.BlockSpec((1, tile_i, num_labels, tile_j),
                                   lambda b, i, j: (b, i, 0, j)),
        ),
        compiler_params=pltpu.CompilerParams(
            dimension_semantics=("parallel", "parallel", "parallel"),
            vmem_limit_bytes=vmem_limit_bytes),
        cost_estimate=pl.CostEstimate(flops=int(flops), transcendentals=0,
                                      bytes_accessed=int(bytes_accessed)),
    )(a_side, c_side, w2_bf, b2_2d, w3_bf, b3_2d)

    if Lp_i != L or Lp_j != L:
        out = out[:, :L, :, :L]
    return out


def init_params(key, input_size, hidden_size, num_labels):
    """Deterministic PyTorch-Linear-style init (uniform +-1/sqrt(fan_in)), f32."""
    ks = jax.random.split(key, 6)

    def lin(kw, kb, fan_in, fan_out):
        bound = 1.0 / jnp.sqrt(fan_in)
        w = jax.random.uniform(kw, (fan_in, fan_out), jnp.float32, -bound, bound)
        b = jax.random.uniform(kb, (fan_out,), jnp.float32, -bound, bound)
        return w, b

    w1, b1 = lin(ks[0], ks[1], 2 * input_size, hidden_size)
    w2, b2 = lin(ks[2], ks[3], hidden_size, hidden_size)
    w3, b3 = lin(ks[4], ks[5], hidden_size, num_labels)
    return (w1, b1, w2, b2, w3, b3)


def reference_forward(x, params):
    """Plain-JAX f32 reference identical to the PyTorch module (eval mode)."""
    w1, b1, w2, b2, w3, b3 = params
    B, L, H = x.shape
    s = jnp.broadcast_to(x[:, :, None, :], (B, L, L, H))
    t = jnp.broadcast_to(x[:, None, :, :], (B, L, L, H))
    cat = jnp.concatenate([s, t], axis=-1)                      # (B,L,L,2H)
    h1 = jnp.maximum(cat @ w1 + b1, 0.0)
    h2 = jnp.maximum(h1 @ w2 + b2, 0.0)
    out = h2 @ w3 + b3                                          # (B,L,L,C)
    return jnp.transpose(out, (0, 1, 3, 2))                     # (B,L,C,L)


if __name__ == "__main__":
    B, H, hidden_size, num_labels = 2, 16, 32, 4

    key = jax.random.PRNGKey(0)
    kx1, kx2, kx3, kp = jax.random.split(key, 4)
    params = init_params(kp, H, hidden_size, num_labels)

    # Kernel runs its GEMMs / intermediates in bf16 with f32 accumulation, so
    # compare to the f32 reference with a correspondingly modest tolerance.
    tol = dict(atol=3e-2, rtol=3e-2)

    # 1) Small shape from the module spec (single full-extent pair tile).
    L = 8
    x = jax.random.normal(kx1, (B, L, H), dtype=jnp.float32)
    out = jax.block_until_ready(mlp_layer_forward(x, params))
    ref = reference_forward(x, params)
    assert out.shape == (B, L, num_labels, L), out.shape
    assert jnp.allclose(out, ref, **tol), "mismatch vs reference (L=8)"

    # 2) Non-multiple L exercising the wrapper-side padding path.
    L = 40
    x = jax.random.normal(kx2, (B, L, H), dtype=jnp.float32)
    out = jax.block_until_ready(mlp_layer_forward(x, params))
    ref = reference_forward(x, params)
    assert out.shape == (B, L, num_labels, L), out.shape
    assert jnp.allclose(out, ref, **tol), "mismatch vs reference (L=40)"

    # 3) Larger shape exercising the tiled, lane-dense (TJ multiple of 128) path.
    L = 256
    x = jax.random.normal(kx3, (B, L, H), dtype=jnp.float32)
    out = jax.block_until_ready(mlp_layer_forward(x, params))
    ref = reference_forward(x, params)
    assert out.shape == (B, L, num_labels, L), out.shape
    assert jnp.allclose(out, ref, **tol), "mismatch vs reference (L=256)"

    print("KERNEL_OK")
</pallas_src>

<mosaic_0001>
module attributes {stable_mosaic.version = 11 : i64} {
  func.func @_mlp_pair_kernel(%arg0: i32, %arg1: i32, %arg2: i32, %arg3: memref<1x8x32xbf16, #tpu.memory_space<vmem>>, %arg4: memref<1x8x32xbf16, #tpu.memory_space<vmem>>, %arg5: memref<32x32xbf16, #tpu.memory_space<vmem>>, %arg6: memref<1x32xf32, #tpu.memory_space<vmem>>, %arg7: memref<32x4xbf16, #tpu.memory_space<vmem>>, %arg8: memref<1x4xf32, #tpu.memory_space<vmem>>, %arg9: memref<1x8x4x8xf32, #tpu.memory_space<vmem>>) attributes {dimension_semantics = [#tpu.dimension_semantics<parallel>, #tpu.dimension_semantics<parallel>, #tpu.dimension_semantics<parallel>], iteration_bounds = array<i64: 2, 1, 1>, scalar_prefetch = 0 : i64, scratch_operands = 0 : i64, tpu.core_type = #tpu.core_type<tc>, window_params = [{transform_indices = @transform_0, window_bounds = array<i64: 1, 8, 32>}, {transform_indices = @transform_1, window_bounds = array<i64: 1, 8, 32>}, {pipeline_mode = #tpu.pipeline_mode<synchronous>, transform_indices = @transform_2, window_bounds = array<i64: 32, 32>}, {pipeline_mode = #tpu.pipeline_mode<synchronous>, transform_indices = @transform_3, window_bounds = array<i64: 1, 32>}, {pipeline_mode = #tpu.pipeline_mode<synchronous>, transform_indices = @transform_4, window_bounds = array<i64: 32, 4>}, {pipeline_mode = #tpu.pipeline_mode<synchronous>, transform_indices = @transform_5, window_bounds = array<i64: 1, 4>}, {transform_indices = @transform_6, window_bounds = array<i64: 1, 8, 4, 8>}]} {
    %c0 = arith.constant 0 : index
    %c0_0 = arith.constant 0 : index
    %c0_1 = arith.constant 0 : index
    %0 = vector.load %arg3[%c0, %c0_0, %c0_1] : memref<1x8x32xbf16, #tpu.memory_space<vmem>>, vector<1x8x32xbf16>
    %1 = vector.shape_cast %0 : vector<1x8x32xbf16> to vector<8x32xbf16>
    %c0_2 = arith.constant 0 : index
    %c0_3 = arith.constant 0 : index
    %c0_4 = arith.constant 0 : index
    %2 = vector.load %arg4[%c0_2, %c0_3, %c0_4] : memref<1x8x32xbf16, #tpu.memory_space<vmem>>, vector<1x8x32xbf16>
    %3 = vector.shape_cast %2 : vector<1x8x32xbf16> to vector<8x32xbf16>
    %4 = vector.shape_cast %1 : vector<8x32xbf16> to vector<8x1x32xbf16>
    %5 = vector.shape_cast %3 : vector<8x32xbf16> to vector<1x8x32xbf16>
    %6 = vector.broadcast %4 : vector<8x1x32xbf16> to vector<8x8x32xbf16>
    %7 = vector.broadcast %5 : vector<1x8x32xbf16> to vector<8x8x32xbf16>
    %8 = arith.addf %6, %7 : vector<8x8x32xbf16>
    %cst = arith.constant 0.000000e+00 : bf16
    %9 = vector.broadcast %cst : bf16 to vector<8x8x32xbf16>
    %10 = arith.maximumf %8, %9 : vector<8x8x32xbf16>
    %11 = vector.shape_cast %10 : vector<8x8x32xbf16> to vector<64x32xbf16>
    %c0_5 = arith.constant 0 : index
    %c0_6 = arith.constant 0 : index
    %12 = vector.load %arg5[%c0_5, %c0_6] : memref<32x32xbf16, #tpu.memory_space<vmem>>, vector<32x32xbf16>
    %cst_7 = arith.constant dense<0.000000e+00> : vector<64x32xf32>
    %13 = tpu.matmul %11, %12, %cst_7 {dimension_numbers = #tpu.dot_dimension_numbers<[1], [0], [0], [1], [0, 0, 1, 1], [], []>} : vector<64x32xbf16>, vector<32x32xbf16>, vector<64x32xf32> -> vector<64x32xf32>
    %c0_8 = arith.constant 0 : index
    %c0_9 = arith.constant 0 : index
    %14 = vector.load %arg6[%c0_8, %c0_9] : memref<1x32xf32, #tpu.memory_space<vmem>>, vector<1x32xf32>
    %15 = vector.broadcast %14 : vector<1x32xf32> to vector<64x32xf32>
    %16 = arith.addf %13, %15 : vector<64x32xf32>
    %cst_10 = arith.constant 0.000000e+00 : f32
    %17 = vector.broadcast %cst_10 : f32 to vector<64x32xf32>
    %18 = arith.maximumf %16, %17 : vector<64x32xf32>
    %19 = arith.truncf %18 : vector<64x32xf32> to vector<64x32xbf16>
    %c0_11 = arith.constant 0 : index
    %c0_12 = arith.constant 0 : index
    %20 = vector.load %arg7[%c0_11, %c0_12] : memref<32x4xbf16, #tpu.memory_space<vmem>>, vector<32x4xbf16>
    %cst_13 = arith.constant dense<0.000000e+00> : vector<64x4xf32>
    %21 = tpu.matmul %19, %20, %cst_13 {dimension_numbers = #tpu.dot_dimension_numbers<[1], [0], [0], [1], [0, 0, 1, 1], [], []>} : vector<64x32xbf16>, vector<32x4xbf16>, vector<64x4xf32> -> vector<64x4xf32>
    %c0_14 = arith.constant 0 : index
    %c0_15 = arith.constant 0 : index
    %22 = vector.load %arg8[%c0_14, %c0_15] : memref<1x4xf32, #tpu.memory_space<vmem>>, vector<1x4xf32>
    %23 = vector.broadcast %22 : vector<1x4xf32> to vector<64x4xf32>
    %24 = arith.addf %21, %23 : vector<64x4xf32>
    %25 = vector.shape_cast %24 : vector<64x4xf32> to vector<8x8x4xf32>
    %26 = tpu.transpose %25, [0, 2, 1] : vector<8x8x4xf32> -> vector<8x4x8xf32>
    %c0_16 = arith.constant 0 : index
    %c0_17 = arith.constant 0 : index
    %c0_18 = arith.constant 0 : index
    %c0_19 = arith.constant 0 : index
    %27 = vector.load %arg9[%c0_16, %c0_17, %c0_18, %c0_19] : memref<1x8x4x8xf32, #tpu.memory_space<vmem>>, vector<1x8x4x8xf32>
    %28 = vector.shape_cast %27 : vector<1x8x4x8xf32> to vector<8x4x8xf32>
    %29 = vector.shape_cast %26 : vector<8x4x8xf32> to vector<1x8x4x8xf32>
    tpu.vector_store %arg9[%c0_16, %c0_17, %c0_18, %c0_19], %29 {strides = array<i32>} : memref<1x8x4x8xf32, #tpu.memory_space<vmem>>, vector<1x8x4x8xf32>,
    return
  }
  func.func @transform_0(%arg0: i32, %arg1: i32, %arg2: i32) -> (i32, i32, i32) {
    %c0_i32 = arith.constant 0 : i32
    %c0_i32_0 = arith.constant 0 : i32
    return %arg0, %arg1, %c0_i32 : i32, i32, i32
  }
  func.func @transform_1(%arg0: i32, %arg1: i32, %arg2: i32) -> (i32, i32, i32) {
    %c0_i32 = arith.constant 0 : i32
    %c0_i32_0 = arith.constant 0 : i32
    return %arg0, %arg2, %c0_i32 : i32, i32, i32
  }
  func.func @transform_2(%arg0: i32, %arg1: i32, %arg2: i32) -> (i32, i32) {
    %c0_i32 = arith.constant 0 : i32
    %c0_i32_0 = arith.constant 0 : i32
    %c0_i32_1 = arith.constant 0 : i32
    return %c0_i32, %c0_i32_0 : i32, i32
  }
  func.func @transform_3(%arg0: i32, %arg1: i32, %arg2: i32) -> (i32, i32) {
    %c0_i32 = arith.constant 0 : i32
    %c0_i32_0 = arith.constant 0 : i32
    %c0_i32_1 = arith.constant 0 : i32
    return %c0_i32, %c0_i32_0 : i32, i32
  }
  func.func @transform_4(%arg0: i32, %arg1: i32, %arg2: i32) -> (i32, i32) {
    %c0_i32 = arith.constant 0 : i32
    %c0_i32_0 = arith.constant 0 : i32
    %c0_i32_1 = arith.constant 0 : i32
    return %c0_i32, %c0_i32_0 : i32, i32
  }
  func.func @transform_5(%arg0: i32, %arg1: i32, %arg2: i32) -> (i32, i32) {
    %c0_i32 = arith.constant 0 : i32
    %c0_i32_0 = arith.constant 0 : i32
    %c0_i32_1 = arith.constant 0 : i32
    return %c0_i32, %c0_i32_0 : i32, i32
  }
  func.func @transform_6(%arg0: i32, %arg1: i32, %arg2: i32) -> (i32, i32, i32, i32) {
    %c0_i32 = arith.constant 0 : i32
    %c0_i32_0 = arith.constant 0 : i32
    return %arg0, %arg1, %c0_i32, %arg2 : i32, i32, i32, i32
  }
}

</mosaic_0001>

<bundles_post_ra>
// kernel: tpu_custom_call.1
= control target key start
LH: loop header
LB: loop body
LE: loop exit
PB: predicated region body
PF: predicated region fallthrough
CT: control target
= control target key end

     0   :  { %s1660_s0 = inlined_call_operand.hbm [shape: bf16[2,8,32], index: 0, kind: input, shape index: {}]   ;;  %s1661_s1 = inlined_call_operand.hbm [shape: bf16[2,8,32], index: 1, kind: input, shape index: {}]   ;;  %s1662_s2 = inlined_call_operand.vmem [shape: bf16[32,32], index: 2, kind: input, shape index: {}]   ;;  %s1663_s3 = inlined_call_operand.vmem [shape: f32[1,32], index: 3, kind: input, shape index: {}]   ;;  %s1664_s4 = inlined_call_operand.vmem [shape: bf16[32,4], index: 4, kind: input, shape index: {}]   ;;  %s1665_s5 = inlined_call_operand.vmem [shape: f32[1,4], index: 5, kind: input, shape index: {}]   ;;  %s1666_s6 = inlined_call_operand.hbm [shape: f32[2,8,4,8], index: 6, kind: output, shape index: {}]  }
   0x1   :  { %1668 = sst [smem:[#allocation12_spill]] %s1660_s0 }
   0x2   :  { %11 = vsyncpa [#allocation3], 0 }
   0x3   :  { %13 = vsyncpa [#allocation3 + $0x1], 0 }
   0x4   :  { %14 = vsyncpa [#allocation6], 0 }
   0x5   :  { %16 = vsyncpa [#allocation6 + $0x1], 0 }
   0x6   :  { %17 = vsyncpa [#allocation4], 0 }
   0x7   :  { %19 = vsyncpa [#allocation4 + $0x1], 0  ;;  %s1447_s21 = smov 0   ;;  %s1449_s22 = smov 0  }
   0x8   :  { %s1451_s23 = smov 0   ;;  %s1453_s24 = smov 0  }
   0x9   :  { %s1455_s25 = smov 0   ;;  %s1457_s26 = smov 0  }
   0xa LB: > { %s1110_s27 = sadd.s32 4294967295, %s1403_s26   ;;  %s1111_s28 = sadd.s32 4294967294, %s1403_s26   ;;  %s1403_s26 = sphi %s1457_s26, %s25_s26   ;;  %s1399_s25 = sphi %s1455_s25, %s1683_s25   ;;  %s1395_s24 = sphi %s1453_s24, %s1682_s24   ;;  %s1391_s23 = sphi %s1451_s23, %s1681_s23   ;;  %s1387_s22 = sphi %s1449_s22, %s1680_s22   ;;  %s1383_s21 = sphi %s1447_s21, %s1679_s21  }
   0xb   : > { %s44_s29 = sadd.s32 1, %s1399_s25  ;;  %s53_s30 = sadd.s32 1, %s1391_s23 }
   0xc   : > { %p46_p0 = scmp.ge.s32.totalorder %s44_s29, 2  ;;  %p60_p1 = scmp.ne.s32.totalorder %s1391_s23, %s1387_s22 }
   0xd   : > { %p61_p2 = scmp.eq.s32.totalorder %s1403_s26, 0  ;;  %p66_p3 = scmp.ne.s32.totalorder %s1387_s22, %s1383_s21 }
   0xe   : > { %s1685_s29 = smov (%p46_p0, %s44_s29), 0  ;;  %p67_p5 = scmp.eq.s32.totalorder %s1110_s27, 0 }
   0xf   : > { %1669 = sst [smem:[#allocation11_spill]] %s1685_s29  ;;  %p1488_p4 = por %p61_p2, %p60_p1 }
  0x10   : > { %s48_s8 = ssub.s32 %s1399_s25, %s1685_s29  ;;  %p206_p6 = scmp.eq.s32.totalorder %s1110_s27, 1 }
  0x11   : > { %p51_p7 = scmp.eq.s32.totalorder %s48_s8, 0  ;;  %p1494_p8 = por %p67_p5, %p66_p3 }
  0x12   : > { %p1498_p9 = por %p206_p6, %p60_p1  ;;  %p212_p10 = scmp.eq.s32.totalorder %s1111_s28, 1 }
  0x13   : > { %s1503_s11 = scalar_select %p51_p7, %s1391_s23, %s53_s30  }
  0x14   : > { %p1505_p11 = por %p212_p10, %p66_p3  ;;  %p1204_p13 = scmp.lt.s32.totalorder %s1403_s26, 2 }
  0x15   : > { %s1512_s13 = sand.u32 1, %s1391_s23   ;;  %s1115_s15 = sshll.u32 %s1399_s25, 6 }
  0x16   : > { %s1114_s14 = sshll.u32 %s1512_s13, 2  ;;  %s1674_s0 = sld [smem:[#allocation12_spill]] }
  0x17   : > { %s248_s19 = scalar_lea.vmem [#allocation2], %s1114_s14  ;;  %p1521_p0 = pnand %p1204_p13, %p1488_p4 }
  0x18   : > { %s256_s20 = sshll.u32 %s248_s19, 4  ;;  %p1118_p1 = scmp.ge.s32.totalorder %s1403_s26, 1  ;;  %s257_s20 = int_to_ptr.vmem [resolvable:$true] %s256_s20 }
  0x19   : > { %p280_p2 = scmp.lt.s32.totalorder %s1403_s26, 3  ;;  %s245_s28 = scalar_lea.sflag [#allocation3], %s1512_s13 }
  0x1a   : > { %p1265_p3 = pneg %p1521_p0  ;;  %s1276_s30 = scalar_lea.vmem %s257_s20, 64 }
  0x1b   : > { %p1277_p5 = scmp.ne.s32.totalorder %s257_s20, %s1276_s30  ;;  %s1405_s8 = smov [#allocation2]  }
  0x1c   : > { %s254_s18 = scalar_lea.hbm %s1674_s0, %s1115_s15  ;;  %s1281_s16 = sshll.u32 %s1405_s8, 4  ;;  %s1282_s16 = int_to_ptr.vmem [resolvable:$false] %s1281_s16 }
  0x1d   : > { %p1279_p6 = pnand %p1277_p5, %p1265_p3  ;;  %s1283_s7 = scalar_lea.vmem %s1282_s16, 128 }
  0x1e   : > { %p1284_p4 = scmp.lt.s32.totalorder %s257_s20, %s1282_s16  ;;  %p1285_p10 = scmp.lt.s32.totalorder %s1283_s7, %s1276_s30 }
  0x1f   : > { %p1280_p7 = pneg %p1279_p6 }
  0x20   : > { %p1286_p13 = por %p1285_p10, %p1284_p4 }
  0x22   : > { %p1287_p12 = pnand %p1286_p13, %p1280_p7 }
  0x24   : > { %1290 = shalt.err (!%p1287_p12)
}
  0x25   : > { %1196 = dma.hbm_to_vmem [thread:$0]  (!%p1521_p0), %s254_s18, 64, %s257_s20, %s245_s28  }
  0x26   : > { %p1539_p5 = pnand %p1118_p1, %p280_p2  ;;  %s273_s30 = scalar_lea.hbm %s1661_s1, %s1115_s15 }
  0x27   : > { %s267_s16 = scalar_lea.vmem [#allocation5], %s1114_s14  ;;  %s264_s0 = scalar_lea.sflag [#allocation6], %s1512_s13 }
  0x28   : > { %s275_s7 = sshll.u32 %s267_s16, 4  ;;  %s1406_s18 = smov [#allocation5]   ;;  %s276_s7 = int_to_ptr.vmem [resolvable:$true] %s275_s7 }
  0x29   : > { %s1304_s29 = scalar_lea.vmem %s276_s7, 64  ;;  %s1309_s20 = sshll.u32 %s1406_s18, 4  ;;  %s1310_s20 = int_to_ptr.vmem [resolvable:$false] %s1309_s20 }
  0x2a   : > { %p1305_p12 = scmp.ne.s32.totalorder %s276_s7, %s1304_s29  ;;  %s1311_s28 = scalar_lea.vmem %s1310_s20, 128 }
  0x2b   : > { %p1312_p1 = scmp.lt.s32.totalorder %s276_s7, %s1310_s20  ;;  %p1313_p2 = scmp.lt.s32.totalorder %s1311_s28, %s1304_s29 }
  0x2c   : > { %p1307_p6 = pnand %p1305_p12, %p1265_p3 }
  0x2d   : > { %p1314_p4 = por %p1313_p2, %p1312_p1 }
  0x2e   : > { %p1308_p7 = pneg %p1307_p6 }
  0x30   : > { %p1315_p10 = pnand %p1314_p4, %p1308_p7 }
  0x32   : > { %1318 = shalt.err (!%p1315_p10)
}
  0x33   : > { %1199 = dma.hbm_to_vmem [thread:$0]  (!%p1521_p0), %s273_s30, 64, %s276_s7, %s264_s0  }
  0x34   : > { %284 = sbr.rel (%p1539_p5) target bundleno = 644 (0x284), region = 44  ;;  %s1555_s13 = sand.u32 (!%p1539_p5), 1, %s1387_s22  }
  0x35   : > { %s1119_s14 = sshll.u32 (!%p1539_p5), %s1555_s13, 2  ;;  %s287_s15 = scalar_lea.sflag (!%p1539_p5), [#allocation3], %s1555_s13 }
  0x36   : > { %s290_s19 = scalar_lea.vmem (!%p1539_p5), [#allocation2], %s1119_s14 }
  0x39   : > { %1370 = dma.done.wait (%p1494_p8), %s287_s15, 64  }
  0x3a   : > { %1372 = vsyncadd (%p1494_p8), %s287_s15, 4294967232  ;;  %s296_s0 = scalar_lea.sflag [#allocation6], %s1555_s13  ;;  %s1564_s29 = scalar_lea.vmem [#allocation5], %s1119_s14 }
  0x3b   : > { %1374 = dma.done.wait (%p1494_p8), %s296_s0, 64  }
  0x3c   : > { %1376 = vsyncadd (%p1494_p8), %s296_s0, 4294967232  ;;  %v349_v0 = vlaneseq  ;;  %v1407_v1 = vmov 1966171168   ;;  %v1259_v6 = vld [vmem:[%s1662_s2 + $0x8] sm:$0xff]   ;;  %v1260_v7 = vld [vmem:[%s1662_s2] sm:$0xff]   ;;  %v1408_v49 = vmov 0  }
  0x3d   : > { %v347_v2 = vunpack.c.l.s4 %v1407_v1  ;;  %1163 = vmatprep.subr.bf16.mxu0 %v1259_v6  ;;  %v1122_v8 = vld.sshfl [vmem:[%s290_s19] sm:$0x33 pattern:$0x75316420]  ;;  %v336_v27 = vld [vmem:[%s1564_s29] sm:$0xf] }
  0x3e   : > { %v350_v3 = vshrl.u32 %v349_v0, 7  ;;  %1164 = vmatpush3.bf16.msra.mxu0 %v1259_v6  ;;  %v345_v10 = vcombine.high %v1122_v8, %v1122_v8  ;;  %vm525_vm0 = vcmask 261120   ;;  %s1121_s19 = sshll.u32 %s1555_s13, 5  ;;  %vm971_vm1 = vcmask 60416   ;;  %s1150_s27 = sshll.u32 %s1395_s24, 9 }
  0x3f   : > { %v348_v4 = vunpack.c.0.s8 %v347_v2  ;;  %1165 = vmatprep.subr.bf16.mxu0 %v1260_v7  ;;  %s332_s0 = scalar_lea.vmem [#allocation7], %s1121_s19  ;;  %s1611_s30 = scalar_lea.hbm %s1666_s6, %s1150_s27 }
  0x40   : > { %v380_v9 = vsub.s32 0, %v350_v3  ;;  %s997_s29 = sshll.u32 %s332_s0, 4  ;;  %s981_s24 = scalar_lea.sflag [#allocation4], %s1555_s13  ;;  %s1604_s29 = int_to_ptr.vmem [resolvable:$true] %s997_s29 }
  0x41   : > { %v351_v5 = vsub.s32 %v348_v4, %v350_v3  ;;  %s1319_s9 = scalar_lea.vmem %s1604_s29, 512  ;;  %s1409_s16 = smov [#allocation7]  }
  0x42   : > { %1166 = vmatpush3.bf16.msra.mxu0 %v1260_v7  ;;  %p1320_p8 = scmp.ne.s32.totalorder %s1604_s29, %s1319_s9  ;;  %s1323_s7 = sshll.u32 %s1409_s16, 4  ;;  %s1324_s7 = int_to_ptr.vmem [resolvable:$false] %s1323_s7 }
  0x43   : > { %v352_v11 = vrot.slane %v1122_v8, %v351_v5  ;;  %v359_v12 = vrot.slane %v345_v10, %v351_v5  ;;  %v1262_v10 = vld [vmem:[%s1664_s4] sm:$0xff]   ;;  %s1325_s18 = scalar_lea.vmem %s1324_s7, 1024  ;;  %p1326_p13 = scmp.lt.s32.totalorder %s1604_s29, %s1324_s7 }
  0x44   : > { %p1321_p0 = pnand %p1320_p8, %p1498_p9  ;;  %p1327_p5 = scmp.lt.s32.totalorder %s1325_s18, %s1319_s9 }
  0x45   : > { %v363_v13 = vunpack.i.h.s16 %v352_v11  ;;  %v1123_v14 = vpack.i.b16 %v352_v11, %v352_v11  ;;  %v360_v15 = vcombine.high %v352_v11, %v352_v11  ;;  %v365_v18 = vunpack.i.h.s16 %v359_v12 }
  0x46   : > { %v1124_v19 = vpack.i.b16 %v359_v12, %v359_v12  ;;  %v361_v22 = vcombine.high %v359_v12, %v359_v12  ;;  %p1322_p3 = pneg %p1321_p0  ;;  %p1328_p12 = por %p1327_p5, %p1326_p13 }
  0x47   : > { %v371_v16 = vpack.i.b16 %v363_v13, %v363_v13  ;;  %v381_v17 = vrot.slane %v1123_v14, %v380_v9  ;;  %v367_v20 = vunpack.i.h.s16 %v360_v15  ;;  %v1125_v21 = vpack.i.b16 %v360_v15, %v360_v15  ;;  %v1127_v13 = vld [vmem:[%s1663_s3] ss:$0 sm:$0xff] }
  0x48   : > { %v373_v25 = vpack.i.b16 %v365_v18, %v365_v18  ;;  %v389_v26 = vrot.slane %v1124_v19, %v380_v9  ;;  %v369_v30 = vunpack.i.h.s16 %v361_v22  ;;  %v1126_v31 = vpack.i.b16 %v361_v22, %v361_v22  ;;  %p1329_p6 = pnand %p1328_p12, %p1322_p3 }
  0x49   : > { %v385_v23 = vrot.slane %v371_v16, %v380_v9  ;;  %v411_v24 = vpack.i.b16 %v381_v17, %v381_v17  ;;  %v375_v28 = vpack.i.b16 %v367_v20, %v367_v20  ;;  %v397_v29 = vrot.slane %v1125_v21, %v380_v9 }
  0x4a   : > { %v393_v34 = vrot.slane %v373_v25, %v380_v9  ;;  %v425_v35 = vpack.i.b16 %v389_v26, %v389_v26  ;;  %v377_v38 = vpack.i.b16 %v369_v30, %v369_v30  ;;  %v405_v39 = vrot.slane %v1126_v31, %v380_v9 }
  0x4b   : > { %v416_v32 = vrot.slane %v411_v24, %v380_v9  ;;  %v418_v33 = vpack.i.b16 %v385_v23, %v385_v23  ;;  %v401_v36 = vrot.slane %v375_v28, %v380_v9  ;;  %v439_v37 = vpack.i.b16 %v397_v29, %v397_v29 }
  0x4c   : > { %v430_v42 = vrot.slane %v425_v35, %v380_v9  ;;  %v432_v43 = vpack.i.b16 %v393_v34, %v393_v34  ;;  %v409_v46 = vrot.slane %v377_v38, %v380_v9  ;;  %v453_v47 = vpack.i.b16 %v405_v39, %v405_v39 }
  0x4d   : > { %v423_v40 = vrot.slane %v418_v33, %v380_v9  ;;  %v466_v41 = vadd.bf16 %v416_v32, %v336_v27  ;;  %v444_v44 = vrot.slane %v439_v37, %v380_v9  ;;  %v446_v45 = vpack.i.b16 %v401_v36, %v401_v36 }
  0x4e   : > { %v437_v51 = vrot.slane %v432_v43, %v380_v9  ;;  %v468_v52 = vadd.bf16 %v430_v42, %v336_v27  ;;  %v458_v55 = vrot.slane %v453_v47, %v380_v9  ;;  %v460_v56 = vpack.i.b16 %v409_v46, %v409_v46 }
  0x4f   : > { %v467_v48 = vadd.bf16 %v423_v40, %v336_v27  ;;  %v474_v50 = vmax.bf16 %v1408_v49, %v466_v41  ;;  %v451_v53 = vrot.slane %v446_v45, %v380_v9  ;;  %v470_v54 = vadd.bf16 %v444_v44, %v336_v27  ;;  %v1138_v40 = vld [vmem:[%s1665_s5] ss:$0 sm:$0xff] }
  0x50   : > { %v469_v58 = vadd.bf16 %v437_v51, %v336_v27  ;;  %v476_v59 = vmax.bf16 %v1408_v49, %v468_v52  ;;  %v465_v62 = vrot.slane %v460_v56, %v380_v9  ;;  %v472_v1 = vadd.bf16 %v458_v55, %v336_v27  ;;  %v1261_v9 = vld [vmem:[%s1664_s4 + $0x8] sm:$0xff]  }
  0x51   : > { %v475_v57 = vmax.bf16 %v1408_v49, %v467_v48  ;;  %v471_v60 = vadd.bf16 %v451_v53, %v336_v27  ;;  %v478_v61 = vmax.bf16 %v1408_v49, %v470_v54  ;;  %1175 = vmatprep.subr.bf16.mxu1 %v1261_v9 }
  0x52   : > { %v477_v0 = vmax.bf16 %v1408_v49, %v469_v58  ;;  %v473_v3 = vadd.bf16 %v465_v62, %v336_v27  ;;  %v480_v6 = vmax.bf16 %v1408_v49, %v472_v1  ;;  %1176 = vmatpush3.bf16.msra.mxu1 %v1261_v9 }
  0x53   : > { %v1128_v63 = vcombine.low %v474_v50, %v475_v57  ;;  %v479_v2 = vmax.bf16 %v1408_v49, %v471_v60  ;;  %1177 = vmatprep.subr.bf16.mxu1 %v1262_v10 }
  0x54   : > { %v1129_v4 = vcombine.low %v476_v59, %v477_v0  ;;  %v481_v7 = vmax.bf16 %v1408_v49, %v473_v3 }
  0x55   : > { %1167 = vmatprep.mubr.msk.bf16.mxu0 %vm525_vm0, %v1128_v63  ;;  %v1130_v5 = vcombine.low %v478_v61, %v479_v2 }
  0x56   : > { %1168 = vmatmul.mubr.msk.bf16.vlgmr.msra.gmra.mxu0 %vm525_vm0, %v1129_v4  ;;  %v1131_v8 = vcombine.low %v480_v6, %v481_v7  ;;  %1178 = vmatpush3.bf16.msra.mxu1 %v1262_v10 }
  0x57   : > { %1171 = vmatprep.mubr.msk.bf16.mxu0 %vm525_vm0, %v1130_v5 }
  0x5e   : > { %1172 = vmatmul.mubr.msk.bf16.gmra.mxu0 %vm525_vm0, %v1131_v8 }
 0x116   : > { %v1169_v11 = vpop.f32.mrf.mxu0 }
 0x117   : > { %v581_v17 = vadd.f32 %v1169_v11, %v1127_v13 }
 0x118   : > { %v572_v12 = vpop.f32.mrf.mxu0 }
 0x119   : > { %v573_v15 = vadd.f32 %v1127_v13, %v572_v12  ;;  %v605_v24 = vmax.f32 %v581_v17, 0.0 }
 0x11a   : > { %v1170_v14 = vpop.f32.mrf.mxu0 }
 0x11b   : > { %v584_v16 = vadd.f32 %v1170_v14, %v1127_v13  ;;  %v603_v22 = vmax.f32 %v573_v15, 0.0 }
 0x11c   : > { %v575_v18 = vpop.f32.mrf.mxu0 }
 0x11d   : > { %v576_v19 = vadd.f32 %v1127_v13, %v575_v18  ;;  %v606_v20 = vmax.f32 %v584_v16, 0.0 }
 0x11e   : > { %v1173_v21 = vpop.f32.mrf.mxu0 }
 0x11f   : > { %v604_v23 = vmax.f32 %v576_v19, 0.0  ;;  %v612_v27 = vpack.c.bf16 %v606_v20, %v605_v24  ;;  %v597_v31 = vadd.f32 %v1173_v21, %v1127_v13 }
 0x120   : > { %v588_v25 = vpop.f32.mrf.mxu0 }
 0x121   : > { %v611_v26 = vpack.c.bf16 %v604_v23, %v603_v22  ;;  %v589_v29 = vadd.f32 %v1127_v13, %v588_v25  ;;  %v609_v37 = vmax.f32 %v597_v31, 0.0 }
 0x122   : > { %v1174_v28 = vpop.f32.mrf.mxu0 }
 0x123   : > { %v600_v30 = vadd.f32 %v1174_v28, %v1127_v13  ;;  %1179 = vmatprep.mubr.msk.bf16.mxu1 %vm525_vm0, %v611_v26  ;;  %v607_v35 = vmax.f32 %v589_v29, 0.0 }
 0x124   : > { %v591_v32 = vpop.f32.mrf.mxu0  ;;  %1180 = vmatmul.mubr.msk.bf16.vlgmr.msra.gmra.mxu1 %vm525_vm0, %v612_v27 }
 0x125   : > { %v592_v33 = vadd.f32 %v1127_v13, %v591_v32  ;;  %v610_v34 = vmax.f32 %v600_v30, 0.0 }
 0x127   : > { %v608_v36 = vmax.f32 %v592_v33, 0.0  ;;  %v614_v39 = vpack.c.bf16 %v610_v34, %v609_v37 }
 0x129   : > { %v613_v38 = vpack.c.bf16 %v608_v36, %v607_v35 }
 0x12b   : > { %1183 = vmatprep.mubr.msk.bf16.mxu1 %vm525_vm0, %v613_v38 }
 0x12c   : > { %1184 = vmatmul.mubr.msk.bf16.gmra.mxu1 %vm525_vm0, %v614_v39 }
 0x1e4   : > { %v1181_v41 = vpop.f32.mrf.mxu1 }
 0x1e5   : > { %v693_v42 = vadd.f32 %v1181_v41, %v1138_v40 }
 0x1e6   : > { %v684_v43 = vpop.f32.mrf.mxu1 }
 0x1e7   : > { %779 = vxpose.xlu1.b32.start.end [1/1] (short) (narrow) %v693_v42, 8  ;;  %v685_v44 = vadd.f32 %v1138_v40, %v684_v43 }
 0x1e8   : > { %v1182_v45 = vpop.f32.mrf.mxu1 }
 0x1e9   : > { %v696_v46 = vadd.f32 %v1182_v45, %v1138_v40  ;;  %715 = vxpose.xlu0.b32.start.end [1/1] (short) (narrow) %v685_v44, 8 }
 0x1ea   : > { %v687_v47 = vpop.f32.mrf.mxu1 }
 0x1eb   : > { %v688_v48 = vadd.f32 %v1138_v40, %v687_v47  ;;  %811 = vxpose.xlu1.b32.start.end [1/1] (short) (narrow) %v696_v46, 8 }
 0x1ec   : > { %v1185_v49 = vpop.f32.mrf.mxu1 }
 0x1ed   : > { %747 = vxpose.xlu0.b32.start.end [1/1] (short) (narrow) %v688_v48, 8  ;;  %v709_v54 = vadd.f32 %v1185_v49, %v1138_v40 }
 0x1ee   : > { %v700_v50 = vpop.f32.mrf.mxu1 }
 0x1ef   : > { %v701_v51 = vadd.f32 %v1138_v40, %v700_v50 }
 0x1f0   : > { %v1186_v52 = vpop.f32.mrf.mxu1 }
 0x1f1   : > { %843 = vxpose.xlu0.b32.start.end [1/1] (short) (narrow) %v701_v51, 8  ;;  %v712_v56 = vadd.f32 %v1186_v52, %v1138_v40 }
 0x1f2   : > { %v703_v53 = vpop.f32.mrf.mxu1 }
 0x1f3   : > { %v704_v55 = vadd.f32 %v1138_v40, %v703_v53 }
 0x1f5   : > { %875 = vxpose.xlu1.b32.start.end [1/1] (short) (narrow) %v704_v55, 8  ;;  %907 = vxpose.xlu0.b32.start.end [1/1] (short) (narrow) %v709_v54, 8 }
 0x1f9   : > { %939 = vxpose.xlu1.b32.start.end [1/1] (short) (narrow) %v712_v56, 8 }
 0x263   : > { %v795_v57 = vpop.trf.xlu1 }
 0x264   : > { %974 = vst.msk [vmem:[%s332_s0 + $0x8] sm:$0xf] %vm971_vm1, %v795_v57 }
 0x265   : > { %v731_v58 = vpop.trf.xlu0 }
 0x266   : > { %972 = vst.msk [vmem:[%s332_s0] sm:$0xf] %vm971_vm1, %v731_v58 }
 0x267   : > { %v827_v59 = vpop.trf.xlu1 }
 0x268   : > { %975 = vst.msk [vmem:[%s332_s0 + $0xc] sm:$0xf] %vm971_vm1, %v827_v59 }
 0x269   : > { %v763_v60 = vpop.trf.xlu0 }
 0x26a   : > { %973 = vst.msk [vmem:[%s332_s0 + $0x4] sm:$0xf] %vm971_vm1, %v763_v60 }
 0x26d   : > { %v859_v61 = vpop.trf.xlu0 }
 0x26e   : > { %976 = vst.msk [vmem:[%s332_s0 + $0x10] sm:$0xf] %vm971_vm1, %v859_v61 }
 0x271   : > { %v891_v62 = vpop.trf.xlu1  ;;  %v923_v63 = vpop.trf.xlu0 }
 0x272   : > { %977 = vst.msk [vmem:[%s332_s0 + $0x14] sm:$0xf] %vm971_vm1, %v891_v62  ;;  %978 = vst.msk [vmem:[%s332_s0 + $0x18] sm:$0xf] %vm971_vm1, %v923_v63 }
 0x275   : > { %v955_v0 = vpop.trf.xlu1 }
 0x276   : > { %979 = vst.msk [vmem:[%s332_s0 + $0x1c] sm:$0xf] %vm971_vm1, %v955_v0 }
 0x277   : > { %1332 = shalt.err (!%p1329_p6)
}
 0x278   : > { %s1333_s20 = scalar_lea.hbm %s1611_s30, 512  ;;  %s1337_s15 = scalar_lea.hbm %s1666_s6, 1024 }
 0x279   : > { %p1334_p7 = scmp.ne.s32.totalorder %s1611_s30, %s1333_s20  ;;  %p1338_p4 = scmp.lt.s32.totalorder %s1611_s30, %s1666_s6 }
 0x27a   : > { %p1339_p10 = scmp.lt.s32.totalorder %s1337_s15, %s1333_s20 }
 0x27b   : > { %p1335_p1 = pnand %p1334_p7, %p1498_p9 }
 0x27c   : > { %p1340_p8 = por %p1339_p10, %p1338_p4 }
 0x27d   : > { %p1336_p2 = pneg %p1335_p1 }
 0x27f   : > { %p1341_p0 = pnand %p1340_p8, %p1336_p2 }
 0x281   : > { %1344 = shalt.err (!%p1341_p0)
}
 0x282   : > { %s1410_s27 = smov 64   ;;  %s1411_s17 = smov 4  }
 0x283   : > { %1191 = dma.vmem_to_hbm [thread:$0]  (%p1498_p9), %s1604_s29, 512, %s1611_s30, %s981_s24, %s1410_s27, %s1410_s27, %s1411_s17  }
 0x284 PF: > { %s1012_s8 = sand.u32 1, %s1383_s21   ;;  %p1677_p3 = scmp.ge.s32.totalorder %s1403_s26, 2 }
 0x285   : > { %s1013_s9 = scalar_lea.sflag [#allocation4], %s1012_s8 }
 0x286   : > { %p1201_p13 = pnand %p1677_p3, %p1505_p11 }
 0x288   : > { %p1202_p5 = pneg %p1201_p13 }
 0x28a   : > { %1378 = dma.done.wait (%p1202_p5), %s1013_s9, 512  }
 0x28b   : > { %1380 = vsyncadd (%p1202_p5), %s1013_s9, 4294966784  ;;  %s25_s26 = sadd.s32 1, %s1403_s26   ;;  %s1678_s10 = sld [smem:[#allocation11_spill]] }
 0x28c   : > { %p22_p12 = scmp.ge.s32.totalorder %s25_s26, 4   ;;  %s1679_s21 = smov %s1387_s22 }
 0x28d   : > { %s1680_s22 = smov %s1391_s23  ;;  %s1681_s23 = smov %s1503_s11 }
 0x28e   : > { %s1682_s24 = smov %s1399_s25  ;;  %24 = sbr.rel (!%p22_p12) target bundleno = 10 (0xa), region = 102 }
 0x291   : > { %s1683_s25 = smov %s1678_s10 }
 0x293   :  { %1018 = vsyncpa [#allocation3], 1 }
 0x294   :  { %1020 = vsyncpa [#allocation3 + $0x1], 1 }
 0x295   :  { %1021 = vsyncpa [#allocation6], 1 }
 0x296   :  { %1023 = vsyncpa [#allocation6 + $0x1], 1 }
 0x297   :  { %1024 = vsyncpa [#allocation4], 1 }
 0x298   :  { %1026 = vsyncpa [#allocation4 + $0x1], 1 }

</bundles_post_ra>
